<compile_context>
chip_gen: v7x
topology: tpu7x:2x2x1
jax: 0.10.0
libtpu: 0.0.40
codegen_flags: <defaults>
</compile_context>

<pallas_src>
import jax
import jax.numpy as jnp
from jax import lax
from jax.experimental import pallas as pl
from jax.experimental.pallas import tpu as pltpu


def _postprocess_init_kernel(ids_ref, lti_ref, out_ref):
    # ids_ref : (n_chunks, B, TS) int32  -- full (padded, chunked) input_ids,
    #                                       constant index_map -> fetched once
    # lti_ref : (B, 1)            int32
    # out_ref : (B, TV)           int32  -- one vocab tile
    n_chunks, B, TS = ids_ref.shape
    TV = out_ref.shape[-1]

    lti = lti_ref[...]                                               # (B, 1)
    v_base = pl.program_id(0) * TV
    v_ids = v_base + lax.broadcasted_iota(jnp.int32, (1, 1, TV), 2)  # (1,1,TV)

    def body(i, acc):
        ids_c = ids_ref[i]                                           # (B, TS)
        s_idx = i * TS + lax.broadcasted_iota(jnp.int32, (B, TS), 1)
        # per-(b,s) validity, kept 2-D (never AND-ed in 3-D)
        valid = (s_idx < lti).astype(jnp.bfloat16)                   # (B, TS)
        # one-hot match against this vocab tile
        onehot = (ids_c[:, :, None] == v_ids).astype(jnp.bfloat16)   # (B,TS,TV)
        # Mask-apply + reduction over the sequence chunk on the MXU.
        # M=8 keeps the lhs sublane-native; row 0 carries the result.
        # bf16 0/1 inputs with f32 accumulation -> exact integer counts.
        valid_m = jnp.broadcast_to(valid[:, None, :], (B, 8, TS))
        cnt = jnp.einsum('bms,bsv->bmv', valid_m, onehot,
                         preferred_element_type=jnp.float32)         # (B,8,TV)
        return acc + cnt[:, 0, :]

    acc = lax.fori_loop(0, n_chunks, body, jnp.zeros((B, TV), jnp.float32))
    out_ref[...] = acc.astype(jnp.int32)


def postprocess_init(input_ids: jax.Array, last_token_index: jax.Array,
                     vocab_size: int, *, vocab_tile: int = 512,
                     seq_tile: int = 256) -> jax.Array:
    """token_count[b, v] = #{s : s < last_token_index[b] and input_ids[b, s] == v}"""
    assert input_ids.ndim == 2
    batch_size, seq_len = input_ids.shape
    assert last_token_index.shape == (batch_size, 1)

    input_ids = input_ids.astype(jnp.int32)
    last_token_index = last_token_index.astype(jnp.int32)

    # Vocab tile: wide (amortizes grid-step overhead, wide stores).  Raise to
    # 1024-2048 on v5e/v6e if desired; 512 keeps the per-chunk bf16 one-hot
    # slab (2*B*TS*TV bytes) at a few MiB on v7x as well.
    tv = min(vocab_tile, vocab_size)
    assert vocab_size % tv == 0, "vocab_size must be a multiple of the vocab tile"

    # Sequence chunking: pad with -1 (never matches a vocab id) and reshape to
    # (n_chunks, B, TS) so the kernel indexes chunks along the leading dim.
    ts = min(seq_tile, seq_len)
    n_chunks = pl.cdiv(seq_len, ts)
    s_pad = n_chunks * ts
    if s_pad != seq_len:
        input_ids = jnp.pad(input_ids, ((0, 0), (0, s_pad - seq_len)),
                            constant_values=-1)
    ids_chunked = input_ids.reshape(batch_size, n_chunks, ts).swapaxes(0, 1)

    grid = (vocab_size // tv,)

    return pl.pallas_call(
        _postprocess_init_kernel,
        out_shape=jax.ShapeDtypeStruct((batch_size, vocab_size), jnp.int32),
        grid_spec=pltpu.PrefetchScalarGridSpec(
            num_scalar_prefetch=0,
            grid=grid,
            in_specs=[
                # full chunked ids, same block for every vocab tile (DMA'd once)
                pl.BlockSpec(ids_chunked.shape, lambda j: (0, 0, 0)),
                # full (B, 1) last_token_index
                pl.BlockSpec((batch_size, 1), lambda j: (0, 0)),
            ],
            out_specs=pl.BlockSpec((batch_size, tv), lambda j: (0, j)),
        ),
        compiler_params=pltpu.CompilerParams(
            dimension_semantics=("parallel",),
            # Explicit budget: resident ids + double-buffered (B, tv) output +
            # per-chunk bf16 one-hot slab stay well under 32 MiB (v7x scoped
            # default; also valid on v5e/v6e).
            vmem_limit_bytes=32 * 1024 * 1024,
        ),
    )(ids_chunked, last_token_index)


if __name__ == "__main__":
    batch_size = 2
    seq_len = 8
    vocab_size = 256

    key = jax.random.PRNGKey(0)
    k_ids, k_lti = jax.random.split(key)
    input_ids = jax.random.randint(k_ids, (batch_size, seq_len), 0, vocab_size,
                                   dtype=jnp.int32)
    last_token_index = jax.random.randint(k_lti, (batch_size, 1), 1, seq_len + 1,
                                          dtype=jnp.int32)

    token_count = postprocess_init(input_ids, last_token_index, vocab_size)
    jax.block_until_ready(token_count)

    # reference check (plain JAX)
    s_idx = jnp.arange(seq_len, dtype=jnp.int32)[None, :]
    valid = s_idx < last_token_index
    onehot = (input_ids[:, :, None] == jnp.arange(vocab_size, dtype=jnp.int32)) \
             & valid[:, :, None]
    ref = jnp.sum(onehot.astype(jnp.int32), axis=1)
    assert token_count.shape == (batch_size, vocab_size)
    assert token_count.dtype == jnp.int32
    assert bool(jnp.all(token_count == ref))

    print("KERNEL_OK")
</pallas_src>

<mosaic_0001>
module attributes {stable_mosaic.version = 11 : i64} {
  func.func @_postprocess_init_kernel(%arg0: i32, %arg1: memref<1x2x8xi32, #tpu.memory_space<vmem>>, %arg2: memref<2x1xi32, #tpu.memory_space<vmem>>, %arg3: memref<2x256xi32, #tpu.memory_space<vmem>>) attributes {dimension_semantics = [#tpu.dimension_semantics<parallel>], iteration_bounds = array<i64: 1>, scalar_prefetch = 0 : i64, scratch_operands = 0 : i64, tpu.core_type = #tpu.core_type<tc>, window_params = [{pipeline_mode = #tpu.pipeline_mode<synchronous>, transform_indices = @transform_0, window_bounds = array<i64: 1, 2, 8>}, {pipeline_mode = #tpu.pipeline_mode<synchronous>, transform_indices = @transform_1, window_bounds = array<i64: 2, 1>}, {transform_indices = @transform_2, window_bounds = array<i64: 2, 256>}]} {
    %c0 = arith.constant 0 : index
    %c0_0 = arith.constant 0 : index
    %0 = vector.load %arg2[%c0, %c0_0] : memref<2x1xi32, #tpu.memory_space<vmem>>, vector<2x1xi32>
    %c256_i32 = arith.constant 256 : i32
    %1 = arith.muli %arg0, %c256_i32 : i32
    %2 = tpu.iota {dimensions = array<i32: 2>} : vector<1x1x256xi32>
    %3 = vector.broadcast %1 : i32 to vector<1x1x256xi32>
    %4 = arith.addi %3, %2 : vector<1x1x256xi32>
    %cst = arith.constant 0.000000e+00 : f32
    %5 = vector.broadcast %cst : f32 to vector<2x256xf32>
    %c0_i32 = arith.constant 0 : i32
    %6 = arith.index_cast %c0_i32 : i32 to index
    %c0_1 = arith.constant 0 : index
    %c0_2 = arith.constant 0 : index
    %7 = vector.load %arg1[%6, %c0_1, %c0_2] : memref<1x2x8xi32, #tpu.memory_space<vmem>>, vector<1x2x8xi32>
    %8 = vector.shape_cast %7 : vector<1x2x8xi32> to vector<2x8xi32>
    %c8_i32 = arith.constant 8 : i32
    %9 = arith.muli %c0_i32, %c8_i32 : i32
    %10 = tpu.iota {dimensions = array<i32: 1>} : vector<2x8xi32>
    %11 = vector.broadcast %9 : i32 to vector<2x8xi32>
    %12 = arith.addi %11, %10 : vector<2x8xi32>
    %13 = vector.broadcast %0 : vector<2x1xi32> to vector<2x8xi32>
    %14 = arith.cmpi slt, %12, %13 : vector<2x8xi32>
    %15 = arith.extui %14 : vector<2x8xi1> to vector<2x8xi32>
    %16 = arith.sitofp %15 : vector<2x8xi32> to vector<2x8xf32>
    %17 = arith.truncf %16 : vector<2x8xf32> to vector<2x8xbf16>
    %18 = vector.shape_cast %8 : vector<2x8xi32> to vector<2x8x1xi32>
    %19 = vector.broadcast %18 : vector<2x8x1xi32> to vector<2x8x256xi32>
    %20 = vector.broadcast %4 : vector<1x1x256xi32> to vector<2x8x256xi32>
    %21 = arith.cmpi eq, %19, %20 : vector<2x8x256xi32>
    %22 = arith.extui %21 : vector<2x8x256xi1> to vector<2x8x256xi32>
    %23 = arith.sitofp %22 : vector<2x8x256xi32> to vector<2x8x256xf32>
    %24 = arith.truncf %23 : vector<2x8x256xf32> to vector<2x8x256xbf16>
    %25 = vector.shape_cast %17 : vector<2x8xbf16> to vector<2x1x8xbf16>
    %26 = vector.shape_cast %25 : vector<2x1x8xbf16> to vector<2x1x8xbf16>
    %27 = vector.broadcast %26 : vector<2x1x8xbf16> to vector<2x8x8xbf16>
    "tpu.trace_start"() <{level = 10 : i32, message = "bms,bsv->bmv"}> : () -> ()
    %cst_3 = arith.constant dense<0.000000e+00> : vector<2x8x256xf32>
    %28 = tpu.matmul %27, %24, %cst_3 {dimension_numbers = #tpu.dot_dimension_numbers<[2], [1], [1], [2], [0, 0, 0, 1, 1, 2], [0], [0]>} : vector<2x8x8xbf16>, vector<2x8x256xbf16>, vector<2x8x256xf32> -> vector<2x8x256xf32>
    "tpu.trace_stop"() : () -> ()
    %29 = vector.extract_strided_slice %28 {offsets = [0, 0, 0], sizes = [2, 1, 256], strides = [1, 1, 1]} : vector<2x8x256xf32> to vector<2x1x256xf32>
    %30 = vector.shape_cast %29 : vector<2x1x256xf32> to vector<2x256xf32>
    %31 = arith.addf %5, %30 : vector<2x256xf32>
    %c1_i32 = arith.constant 1 : i32
    %32 = arith.fptosi %31 : vector<2x256xf32> to vector<2x256xi32>
    %c0_4 = arith.constant 0 : index
    %c0_5 = arith.constant 0 : index
    %33 = vector.load %arg3[%c0_4, %c0_5] : memref<2x256xi32, #tpu.memory_space<vmem>>, vector<2x256xi32>
    tpu.vector_store %arg3[%c0_4, %c0_5], %32 {strides = array<i32>} : memref<2x256xi32, #tpu.memory_space<vmem>>, vector<2x256xi32>,
    return
  }
  func.func @transform_0(%arg0: i32) -> (i32, i32, i32) {
    %c0_i32 = arith.constant 0 : i32
    %c0_i32_0 = arith.constant 0 : i32
    %c0_i32_1 = arith.constant 0 : i32
    %c0_i32_2 = arith.constant 0 : i32
    return %c0_i32, %c0_i32_0, %c0_i32_1 : i32, i32, i32
  }
  func.func @transform_1(%arg0: i32) -> (i32, i32) {
    %c0_i32 = arith.constant 0 : i32
    %c0_i32_0 = arith.constant 0 : i32
    %c0_i32_1 = arith.constant 0 : i32
    return %c0_i32, %c0_i32_0 : i32, i32
  }
  func.func @transform_2(%arg0: i32) -> (i32, i32) {
    %c0_i32 = arith.constant 0 : i32
    %c0_i32_0 = arith.constant 0 : i32
    return %c0_i32, %arg0 : i32, i32
  }
}

</mosaic_0001>

<bundles_post_ra>
// kernel: tpu_custom_call.1
= control target key start
LH: loop header
LB: loop body
LE: loop exit
PB: predicated region body
PF: predicated region fallthrough
CT: control target
= control target key end

     0   :  { %v15_v1 = vlaneseq  ;;  %v302_v2 = vmov 0   ;;  %s350_s0 = inlined_call_operand.vmem [shape: s32[1,2,8], index: 0, kind: input, shape index: {}]   ;;  %s351_s1 = inlined_call_operand.vmem [shape: s32[2,1], index: 1, kind: input, shape index: {}]   ;;  %s352_s2 = inlined_call_operand.hbm [shape: s32[2,256], index: 2, kind: output, shape index: {}]  }
   0x1   :  { %v13_v0 = vld [vmem:[%s351_s1] sm:$0x3]  ;;  %277 = vset.pattern.permute.xlu0 %v302_v2  ;;  %143 = vmatprep.mubr.bf16.mxu0 %v302_v2 }
   0x2   :  { %7 = vsyncpa [#allocation3], 0  ;;  %23 = vperm.xlu0 %277, %v13_v0   ;;  %v325_v3 = vshrl.u32 %v15_v1, 7  ;;  %193 = vmatprep.mubr.bf16.mxu1 %v302_v2  ;;  %v21_v4 = vld [vmem:[%s350_s0] sm:$0x3]  ;;  %v16_v9 = vand.u32 127, %v15_v1 }
   0x3   :  { %v303_v11 = vmov 1966171168   ;;  %v304_v14 = vmov 0.0   ;;  %vm104_vm2 = vcmask 1043456   ;;  %vm100_vm6 = vcmask 64512   ;;  %s306_s0 = smov [#allocation2]  }
   0x4   :  { %v31_v5 = vsub.s32 0, %v325_v3  ;;  %v38_v6 = vsub.s32 1, %v325_v3  ;;  %v17_v10 = vadd.s32 128, %v16_v9  ;;  %v61_v12 = vunpack.c.l.s4 %v303_v11  ;;  %s246_s1 = sshll.u32 %s306_s0, 4  ;;  %s247_s1 = int_to_ptr.vmem [resolvable:$true] %s246_s1 }
   0x5   :  { %v305_v43 = vmov 1983009808   ;;  %vm231_vm7 = vcmask 1041409   ;;  %vm233_vm8 = vcmask 1043459   ;;  %vm235_vm9 = vcmask 1045509   ;;  %s278_s13 = scalar_lea.vmem %s247_s1, 64  ;;  %p283_p1 = scmp.lt.s32.totalorder %s247_s1, %s247_s1 }
   0x6   :  { %v32_v7 = vrot.slane %v21_v4, %v31_v5  ;;  %v39_v8 = vrot.slane %v21_v4, %v38_v6  ;;  %v62_v19 = vunpack.c.0.s8 %v61_v12  ;;  %v212_v44 = vunpack.c.l.s4 %v305_v43  ;;  %p279_p0 = scmp.ne.s32.totalorder %s247_s1, %s278_s13  ;;  %p284_p2 = scmp.lt.s32.totalorder %s278_s13, %s278_s13 }
   0x7   :  { %vm237_vm10 = vcmask 1047559  }
   0x8   :  { %34 = vbcast.lane.b32.xlu1 %v32_v7, 256  ;;  %41 = vbcast.lane.b32.xlu0 %v39_v8, 256  ;;  %v65_v22 = vsub.s32 %v62_v19, %v325_v3  ;;  %v213_v55 = vunpack.c.0.s8 %v212_v44  ;;  %p285_p3 = por %p284_p2, %p283_p1 }
   0xa   :  { %v216_v62 = vsub.s32 %v213_v55, %v325_v3  ;;  %p286_p4 = pnand %p285_p3, %p279_p0 }
  0x7a   :  { %v35_v13 = vpop.permute.xlu1 %34 }
  0x7b   :  { %vm43_vm0 = vcmp.eq.s32.totalorder %v35_v13, %v16_v9  ;;  %vm44_vm1 = vcmp.eq.s32.totalorder %v35_v13, %v17_v10 }
  0x7c   :  { %v255_v15 = vsel %vm43_vm0, 1.0, %v304_v14  ;;  %v256_v16 = vsel %vm44_vm1, 1.0, %v304_v14 }
  0x7d   :  { %v55_v17 = vpack.c.bf16 %v255_v15, %v255_v15  ;;  %v56_v18 = vpack.c.bf16 %v256_v16, %v256_v16 }
  0x7f   :  { %260 = vmatprep.subr.msk.bf16.mxu0 %vm104_vm2, %v56_v18  ;;  %v106_v20 = vsel %vm104_vm2, %v55_v17, 0 }
  0x80   :  { %112 = vmatpush1.bf16.msra.mxu0 %v106_v20 }
  0x81   :  { %v24_v21 = vpop.permute.xlu0 %23 }
  0x82   :  { %vm25_vm3 = vcmp.lt.s32.totalorder %v16_v9, %v24_v21 }
  0x83   :  { %v254_v23 = vsel %vm25_vm3, 1.0, %v304_v14 }
  0x84   :  { %v28_v24 = vpack.c.bf16 %v254_v23, %v254_v23 }
  0x85   :  { %v42_v25 = vpop.permute.xlu0 %41 }
  0x86   :  { %v66_v26 = vrot.slane %v28_v24, %v65_v22  ;;  %vm45_vm4 = vcmp.eq.s32.totalorder %v42_v25, %v16_v9  ;;  %vm46_vm5 = vcmp.eq.s32.totalorder %v42_v25, %v17_v10 }
  0x87   :  { %v257_v27 = vsel %vm45_vm4, 1.0, %v304_v14  ;;  %v258_v28 = vsel %vm46_vm5, 1.0, %v304_v14 }
  0x88   :  { %v73_v29 = vrot.slane %v66_v26, %v65_v22  ;;  %v57_v30 = vpack.c.bf16 %v257_v27, %v257_v27  ;;  %v58_v31 = vpack.c.bf16 %v258_v28, %v258_v28 }
  0x8a   :  { %v75_v32 = vunpack.i.h.s16 %v73_v29  ;;  %v259_v33 = vpack.i.b16 %v73_v29, %v73_v29  ;;  %262 = vmatprep.subr.msk.bf16.mxu1 %vm104_vm2, %v58_v31  ;;  %v156_v34 = vsel %vm104_vm2, %v57_v30, 0 }
  0x8b   :  { %162 = vmatpush1.bf16.msra.mxu1 %v156_v34 }
  0x8c   :  { %v77_v35 = vpack.i.b16 %v75_v32, %v75_v32  ;;  %v81_v36 = vrot.slane %v259_v33, %v31_v5 }
  0x8e   :  { %v87_v37 = vpack.i.b16 %v81_v36, %v81_v36  ;;  %v85_v38 = vrot.slane %v77_v35, %v31_v5 }
  0x90   :  { %v92_v39 = vrot.slane %v87_v37, %v31_v5  ;;  %v94_v40 = vpack.i.b16 %v85_v38, %v85_v38 }
  0x92   :  { %261 = vmatmul.mubr.msk.bf16.vlgmr.msra.gmra.mrb[0].mxu0 %vm100_vm6, %v92_v39  ;;  %v99_v41 = vrot.slane %v94_v40, %v31_v5 }
  0x94   :  { %263 = vmatmul.mubr.msk.bf16.vlgmr.msra.gmra.mrb[0].mxu1 %vm100_vm6, %v99_v41 }
 0x165   :  { %v145_v42 = vpop.f32.mrb[0].mxu0 }
 0x166   :  { %v264_v45 = vtrunc.f32 %v145_v42  ;;  %v147_v46 = vpop.f32.mrb[1].mxu0 }
 0x167   :  { %v266_v47 = vtrunc.f32 %v147_v46  ;;  %v149_v48 = vpop.f32.mrb[2].mxu0  ;;  %v195_v49 = vpop.f32.mrb[0].mxu1 }
 0x168   :  { %v265_v50 = vcvt.f32.s32 %v264_v45  ;;  %v268_v51 = vtrunc.f32 %v195_v49  ;;  %v150_v52 = vpop.f32.mrb[3].mxu0  ;;  %v197_v53 = vpop.f32.mrb[1].mxu1 }
 0x169   :  { %v267_v54 = vcvt.f32.s32 %v266_v47  ;;  %v270_v56 = vtrunc.f32 %v197_v53  ;;  %v199_v57 = vpop.f32.mrb[2].mxu1 }
 0x16a   :  { %v269_v58 = vcvt.f32.s32 %v268_v51  ;;  %v200_v59 = vpop.f32.mrb[3].mxu1 }
 0x16b   :  { %v210_v60 = vcombine.low %v265_v50, %v267_v54  ;;  %v271_v61 = vcvt.f32.s32 %v270_v56 }
 0x16d   :  { %v218_v63 = vcombine.low %v269_v58, %v271_v61  ;;  %v217_v1 = vrot.slane %v210_v60, %v216_v62 }
 0x16f   :  { %v225_v0 = vrot.slane %v218_v63, %v216_v62 }
 0x171   :  { %v230_v2 = vrot.slane %v225_v0, 7 }
 0x173   :  { %v232_v4 = vsel %vm231_vm7, %v230_v2, %v217_v1 }
 0x174   :  { %v234_v5 = vsel %vm233_vm8, %v230_v2, %v232_v4 }
 0x175   :  { %v236_v6 = vsel %vm235_vm9, %v230_v2, %v234_v5 }
 0x176   :  { %v238_v7 = vsel %vm237_vm10, %v230_v2, %v236_v6 }
 0x177   :  { %239 = vst [vmem:[#allocation2] sm:$0xf] %v238_v7 }
 0x178   :  { %289 = shalt.err (!%p286_p4)
}
 0x179   :  { %s290_s16 = scalar_lea.hbm %s352_s2, 64 }
 0x17a   :  { %p291_p5 = scmp.ne.s32.totalorder %s352_s2, %s290_s16  ;;  %p294_p6 = scmp.lt.u32.totalorder %s290_s16, %s352_s2 }
 0x17c   :  { %p296_p7 = pnand %p294_p6, %p291_p5 }
 0x17e   :  { %299 = shalt.err (!%p296_p7)
}
 0x17f   :  { %249 = dma.vmem_to_hbm [thread:$0]  %s247_s1, 64, %s352_s2, [#allocation3]  }
 0x180   :  { %300 = dma.done.wait [#allocation3], 64  }
 0x181   :  { %301 = vsyncadd [#allocation3], 4294967232 }
 0x182   :  { %253 = vsyncpa [#allocation3], 1 }

</bundles_post_ra>
